<compile_context>
chip_gen: v7x
topology: tpu7x:2x2x1
jax: 0.10.0
libtpu: 0.0.40
codegen_flags: <defaults>
</compile_context>

<pallas_src>
import math
import numpy as np
import jax
import jax.numpy as jnp
from jax.experimental import pallas as pl
from jax.experimental.pallas import tpu as pltpu


# ----------------------------------------------------------------------------
# Helpers
# ----------------------------------------------------------------------------
def _nbytes(shape, dtype):
    n = 1
    for d in shape:
        n *= int(d)
    return n * jnp.dtype(dtype).itemsize


def _vmem_limit(block_bytes):
    # ~2 pipeline buffers per block plus headroom for f32 intermediates,
    # clamped under v7x's 64 MiB physical VMEM per TensorCore (review item).
    return int(min(max(4 * block_bytes, 8 * 1024 * 1024), 48 * 1024 * 1024))


# ----------------------------------------------------------------------------
# Kernel 1: fused, lane-dense QKV projection   (S, D) @ (D, 3D)
# ----------------------------------------------------------------------------
def _qkv_proj_kernel(x_ref, w_ref, b_ref, qkv_ref):
    x = x_ref[0]                                             # (S, D)
    acc = jnp.dot(x, w_ref[...], preferred_element_type=jnp.float32)
    qkv_ref[0] = (acc + b_ref[...]).astype(qkv_ref.dtype)    # bias add in f32


# ----------------------------------------------------------------------------
# Kernel 2: per-(batch, query-tile) attention + output projection + FFN
# ----------------------------------------------------------------------------
def _make_attn_ffn_kernel(scale, has_mask, return_attn, compute_dtype):
    def kernel(*refs):
        i = 0
        q_ref, k_ref, v_ref = refs[0], refs[1], refs[2]
        i = 3
        mask_ref = None
        if has_mask:
            mask_ref = refs[i]
            i += 1
        wo_ref, bo_ref, w1_ref, b1_ref, w2_ref, b2_ref = refs[i:i + 6]
        i += 6
        out_ref = refs[i]
        i += 1
        attn_ref = refs[i] if return_attn else None

        q = q_ref[0]                                          # (H, tq, dh)
        k = k_ref[0]                                          # (H, S,  dh)
        v = v_ref[0]                                          # (H, S,  dh)

        # Scores: batched NT contraction over all heads, f32 accumulation.
        s = jnp.einsum('hqe,hke->hqk', q, k,
                       preferred_element_type=jnp.float32) * scale
        if has_mask:
            keep = mask_ref[0] > 0                            # (tq, S) bool
            s = jnp.where(keep[None, :, :], s, -1e9)          # masked fill, f32

        # Softmax in f32; reciprocal goes to the EUP slot.
        m = jnp.max(s, axis=-1, keepdims=True)
        e = jnp.exp(s - m)
        p = e * pl.reciprocal(jnp.sum(e, axis=-1, keepdims=True), approx=True)

        if return_attn:
            attn_ref[0] = p.astype(attn_ref.dtype)            # (H, tq, S) bf16

        ctx = jnp.einsum('hqk,hke->hqe', p.astype(compute_dtype), v,
                         preferred_element_type=jnp.float32)  # (H, tq, dh)

        # Output projection without a lane-axis concat:
        #   concat_h(ctx_h) @ Wo == sum_h ctx_h @ Wo[h]   (Wo rows head-major)
        proj = jnp.einsum('hqe,hed->hqd', ctx.astype(compute_dtype), wo_ref[...],
                          preferred_element_type=jnp.float32)  # (H, tq, D)
        attn_out = jnp.sum(proj, axis=0) + bo_ref[...]          # (tq, D) f32

        # FeedForward: Linear -> ReLU -> (dropout = identity) -> Linear.
        h1 = jnp.maximum(
            jnp.dot(attn_out.astype(compute_dtype), w1_ref[...],
                    preferred_element_type=jnp.float32) + b1_ref[...], 0.0)
        y = jnp.dot(h1.astype(compute_dtype), w2_ref[...],
                    preferred_element_type=jnp.float32) + b2_ref[...]
        out_ref[0] = y.astype(out_ref.dtype)

    return kernel


# ----------------------------------------------------------------------------
# Wrapper
# ----------------------------------------------------------------------------
def encoder_layer(src, params, n_head, src_mask=None, *,
                  return_attn=True, use_bf16=True, q_tile=128):
    """src: (B, S, D) float32.  src_mask: optional (B, S, S), 1=keep / 0=mask."""
    B, S, D = src.shape
    assert D % n_head == 0
    dh = D // n_head
    Hf = params["w1"].shape[1]
    cdt = jnp.bfloat16 if use_bf16 else jnp.float32
    attn_dtype = jnp.bfloat16 if use_bf16 else jnp.float32
    scale = 1.0 / math.sqrt(dh)

    tq = min(q_tile, S)
    assert S % tq == 0, "sequence length must be divisible by the query tile"
    nq = S // tq

    # ---------------- stage 1: fused lane-dense QKV projection -------------
    w_qkv = jnp.concatenate(
        [params["wq"], params["wk"], params["wv"]], axis=1).astype(cdt)   # (D, 3D)
    b_qkv = jnp.concatenate(
        [params["bq"], params["bk"], params["bv"]], axis=1).astype(jnp.float32)
    src_c = src.astype(cdt)

    qkv_block_bytes = (_nbytes((1, S, D), cdt) + _nbytes((D, 3 * D), cdt)
                       + _nbytes((1, 3 * D), jnp.float32)
                       + _nbytes((1, S, 3 * D), cdt))
    qkv = pl.pallas_call(
        _qkv_proj_kernel,
        grid_spec=pltpu.PrefetchScalarGridSpec(
            num_scalar_prefetch=0,
            grid=(B,),
            in_specs=[pl.BlockSpec((1, S, D), lambda b: (b, 0, 0)),
                      pl.BlockSpec((D, 3 * D), lambda b: (0, 0)),
                      pl.BlockSpec((1, 3 * D), lambda b: (0, 0))],
            out_specs=pl.BlockSpec((1, S, 3 * D), lambda b: (b, 0, 0))),
        out_shape=jax.ShapeDtypeStruct((B, S, 3 * D), cdt),
        compiler_params=pltpu.CompilerParams(
            dimension_semantics=("parallel",),
            vmem_limit_bytes=_vmem_limit(qkv_block_bytes)),
    )(src_c, w_qkv, b_qkv)

    # Head split done by XLA between the two kernels (cheap copy; avoids
    # lane-splitting reshapes inside the Mosaic kernel).
    qkv = qkv.reshape(B, S, 3, n_head, dh)
    q = jnp.transpose(qkv[:, :, 0], (0, 2, 1, 3))   # (B, H, S, dh)
    k = jnp.transpose(qkv[:, :, 1], (0, 2, 1, 3))
    v = jnp.transpose(qkv[:, :, 2], (0, 2, 1, 3))

    # ---------------- stage 2: attention + out-proj + FFN ------------------
    wo = params["wo"].reshape(n_head, dh, D).astype(cdt)     # rows per head
    bo = params["bo"].astype(jnp.float32)
    w1 = params["w1"].astype(cdt)
    b1 = params["b1"].astype(jnp.float32)
    w2 = params["w2"].astype(cdt)
    b2 = params["b2"].astype(jnp.float32)

    has_mask = src_mask is not None

    const2 = lambda b, t: (0, 0)
    const3 = lambda b, t: (0, 0, 0)

    in_specs = [
        pl.BlockSpec((1, n_head, tq, dh), lambda b, t: (b, 0, t, 0)),   # q tile
        pl.BlockSpec((1, n_head, S, dh), lambda b, t: (b, 0, 0, 0)),    # k (full S)
        pl.BlockSpec((1, n_head, S, dh), lambda b, t: (b, 0, 0, 0)),    # v (full S)
    ]
    inputs = [q, k, v]
    block_bytes = (_nbytes((1, n_head, tq, dh), cdt)
                   + 2 * _nbytes((1, n_head, S, dh), cdt))
    if has_mask:
        in_specs.append(pl.BlockSpec((1, tq, S), lambda b, t: (b, t, 0)))
        inputs.append(src_mask.astype(cdt))                  # bf16 mask: half DMA
        block_bytes += _nbytes((1, tq, S), cdt)

    in_specs += [
        pl.BlockSpec((n_head, dh, D), const3),               # Wo (head-major)
        pl.BlockSpec((1, D), const2),                        # bo
        pl.BlockSpec((D, Hf), const2), pl.BlockSpec((1, Hf), const2),   # W1, b1
        pl.BlockSpec((Hf, D), const2), pl.BlockSpec((1, D), const2),    # W2, b2
    ]
    inputs += [wo, bo, w1, b1, w2, b2]
    block_bytes += (_nbytes((n_head, dh, D), cdt) + _nbytes((1, D), jnp.float32)
                    + _nbytes((D, Hf), cdt) + _nbytes((1, Hf), jnp.float32)
                    + _nbytes((Hf, D), cdt) + _nbytes((1, D), jnp.float32))

    out_specs = [pl.BlockSpec((1, tq, D), lambda b, t: (b, t, 0))]
    out_shapes = [jax.ShapeDtypeStruct((B, S, D), jnp.float32)]
    block_bytes += _nbytes((1, tq, D), jnp.float32)
    if return_attn:
        out_specs.append(pl.BlockSpec((1, n_head, tq, S), lambda b, t: (b, 0, t, 0)))
        out_shapes.append(jax.ShapeDtypeStruct((B, n_head, S, S), attn_dtype))
        block_bytes += _nbytes((1, n_head, tq, S), attn_dtype)

    kernel = _make_attn_ffn_kernel(scale, has_mask, return_attn, cdt)

    result = pl.pallas_call(
        kernel,
        grid_spec=pltpu.PrefetchScalarGridSpec(
            num_scalar_prefetch=0,
            grid=(B, nq),
            in_specs=in_specs,
            out_specs=out_specs),
        out_shape=tuple(out_shapes),
        compiler_params=pltpu.CompilerParams(
            dimension_semantics=("parallel", "parallel"),
            vmem_limit_bytes=_vmem_limit(block_bytes)),
    )(*inputs)

    if return_attn:
        return result[0], result[1]
    return result[0]


# ----------------------------------------------------------------------------
# Parameter init + pure-JAX f32 reference
# ----------------------------------------------------------------------------
def init_params(key, d_model, n_head, ffn_hidden):
    ks = jax.random.split(key, 12)
    sc_d = 1.0 / math.sqrt(d_model)
    sc_h = 1.0 / math.sqrt(ffn_hidden)
    return {
        "wq": jax.random.normal(ks[0], (d_model, d_model), jnp.float32) * sc_d,
        "bq": jax.random.normal(ks[1], (1, d_model), jnp.float32) * 0.01,
        "wk": jax.random.normal(ks[2], (d_model, d_model), jnp.float32) * sc_d,
        "bk": jax.random.normal(ks[3], (1, d_model), jnp.float32) * 0.01,
        "wv": jax.random.normal(ks[4], (d_model, d_model), jnp.float32) * sc_d,
        "bv": jax.random.normal(ks[5], (1, d_model), jnp.float32) * 0.01,
        "wo": jax.random.normal(ks[6], (d_model, d_model), jnp.float32) * sc_d,
        "bo": jax.random.normal(ks[7], (1, d_model), jnp.float32) * 0.01,
        "w1": jax.random.normal(ks[8], (d_model, ffn_hidden), jnp.float32) * sc_d,
        "b1": jax.random.normal(ks[9], (1, ffn_hidden), jnp.float32) * 0.01,
        "w2": jax.random.normal(ks[10], (ffn_hidden, d_model), jnp.float32) * sc_h,
        "b2": jax.random.normal(ks[11], (1, d_model), jnp.float32) * 0.01,
    }


def reference_encoder_layer(src, params, n_head, src_mask=None):
    B, S, D = src.shape
    dh = D // n_head
    if src_mask is None:
        src_mask = jnp.ones((B, S, S), jnp.float32)
    q = src @ params["wq"] + params["bq"]
    k = src @ params["wk"] + params["bk"]
    v = src @ params["wv"] + params["bv"]
    q = q.reshape(B, S, n_head, dh).transpose(0, 2, 1, 3)
    k = k.reshape(B, S, n_head, dh).transpose(0, 2, 1, 3)
    v = v.reshape(B, S, n_head, dh).transpose(0, 2, 1, 3)
    s = jnp.einsum("bhqd,bhkd->bhqk", q, k) / math.sqrt(dh)
    s = jnp.where(src_mask[:, None, :, :] > 0.0, s, -1e9)
    attn = jax.nn.softmax(s, axis=-1)
    ctx = jnp.einsum("bhqk,bhkd->bhqd", attn, v)
    ctx = ctx.transpose(0, 2, 1, 3).reshape(B, S, D)
    out = ctx @ params["wo"] + params["bo"]
    h1 = jax.nn.relu(out @ params["w1"] + params["b1"])
    y = h1 @ params["w2"] + params["b2"]
    return y, attn


if __name__ == "__main__":
    B, S = 2, 8
    d_model, n_head, ffn_hidden = 32, 4, 64

    key = jax.random.PRNGKey(0)
    k_param, k_src = jax.random.split(key)
    params = init_params(k_param, d_model, n_head, ffn_hidden)
    src = jax.random.normal(k_src, (B, S, d_model), jnp.float32)

    # bf16 MXU operands with f32 accumulation vs. a pure-f32 reference.
    RTOL, ATOL = 2e-2, 2e-2

    # 1) No mask, attention probabilities returned (bf16 attn writeback).
    out, attn = encoder_layer(src, params, n_head, src_mask=None,
                              return_attn=True, use_bf16=True)
    out = jax.block_until_ready(out)
    attn = jax.block_until_ready(attn)
    ref_out, ref_attn = reference_encoder_layer(src, params, n_head, src_mask=None)
    np.testing.assert_allclose(np.asarray(out), np.asarray(ref_out),
                               rtol=RTOL, atol=ATOL)
    np.testing.assert_allclose(np.asarray(attn.astype(jnp.float32)),
                               np.asarray(ref_attn), rtol=RTOL, atol=ATOL)

    # 2) Causal mask, attention writeback skipped (cheaper HBM path).
    causal = jnp.tril(jnp.ones((S, S), jnp.float32))[None].repeat(B, axis=0)
    out_m = encoder_layer(src, params, n_head, src_mask=causal,
                          return_attn=False, use_bf16=True)
    out_m = jax.block_until_ready(out_m)
    ref_out_m, _ = reference_encoder_layer(src, params, n_head, src_mask=causal)
    np.testing.assert_allclose(np.asarray(out_m), np.asarray(ref_out_m),
                               rtol=RTOL, atol=ATOL)

    print("KERNEL_OK")
</pallas_src>

<mosaic_0001>
module attributes {stable_mosaic.version = 11 : i64} {
  func.func @_qkv_proj_kernel(%arg0: i32, %arg1: memref<1x8x32xbf16, #tpu.memory_space<vmem>>, %arg2: memref<32x96xbf16, #tpu.memory_space<vmem>>, %arg3: memref<1x96xf32, #tpu.memory_space<vmem>>, %arg4: memref<1x8x96xbf16, #tpu.memory_space<vmem>>) attributes {dimension_semantics = [#tpu.dimension_semantics<parallel>], iteration_bounds = array<i64: 2>, scalar_prefetch = 0 : i64, scratch_operands = 0 : i64, tpu.core_type = #tpu.core_type<tc>, window_params = [{transform_indices = @transform_0, window_bounds = array<i64: 1, 8, 32>}, {pipeline_mode = #tpu.pipeline_mode<synchronous>, transform_indices = @transform_1, window_bounds = array<i64: 32, 96>}, {pipeline_mode = #tpu.pipeline_mode<synchronous>, transform_indices = @transform_2, window_bounds = array<i64: 1, 96>}, {transform_indices = @transform_3, window_bounds = array<i64: 1, 8, 96>}]} {
    %c0 = arith.constant 0 : index
    %c0_0 = arith.constant 0 : index
    %c0_1 = arith.constant 0 : index
    %0 = vector.load %arg1[%c0, %c0_0, %c0_1] : memref<1x8x32xbf16, #tpu.memory_space<vmem>>, vector<1x8x32xbf16>
    %1 = vector.shape_cast %0 : vector<1x8x32xbf16> to vector<8x32xbf16>
    %c0_2 = arith.constant 0 : index
    %c0_3 = arith.constant 0 : index
    %2 = vector.load %arg2[%c0_2, %c0_3] : memref<32x96xbf16, #tpu.memory_space<vmem>>, vector<32x96xbf16>
    %cst = arith.constant dense<0.000000e+00> : vector<8x96xf32>
    %3 = tpu.matmul %1, %2, %cst {dimension_numbers = #tpu.dot_dimension_numbers<[1], [0], [0], [1], [0, 0, 1, 1], [], []>} : vector<8x32xbf16>, vector<32x96xbf16>, vector<8x96xf32> -> vector<8x96xf32>
    %c0_4 = arith.constant 0 : index
    %c0_5 = arith.constant 0 : index
    %4 = vector.load %arg3[%c0_4, %c0_5] : memref<1x96xf32, #tpu.memory_space<vmem>>, vector<1x96xf32>
    %5 = vector.broadcast %4 : vector<1x96xf32> to vector<8x96xf32>
    %6 = arith.addf %3, %5 : vector<8x96xf32>
    %7 = arith.truncf %6 : vector<8x96xf32> to vector<8x96xbf16>
    %c0_6 = arith.constant 0 : index
    %c0_7 = arith.constant 0 : index
    %c0_8 = arith.constant 0 : index
    %8 = vector.load %arg4[%c0_6, %c0_7, %c0_8] : memref<1x8x96xbf16, #tpu.memory_space<vmem>>, vector<1x8x96xbf16>
    %9 = vector.shape_cast %8 : vector<1x8x96xbf16> to vector<8x96xbf16>
    %10 = vector.shape_cast %7 : vector<8x96xbf16> to vector<1x8x96xbf16>
    tpu.vector_store %arg4[%c0_6, %c0_7, %c0_8], %10 {strides = array<i32>} : memref<1x8x96xbf16, #tpu.memory_space<vmem>>, vector<1x8x96xbf16>,
    return
  }
  func.func @transform_0(%arg0: i32) -> (i32, i32, i32) {
    %c0_i32 = arith.constant 0 : i32
    %c0_i32_0 = arith.constant 0 : i32
    %c0_i32_1 = arith.constant 0 : i32
    return %arg0, %c0_i32, %c0_i32_0 : i32, i32, i32
  }
  func.func @transform_1(%arg0: i32) -> (i32, i32) {
    %c0_i32 = arith.constant 0 : i32
    %c0_i32_0 = arith.constant 0 : i32
    %c0_i32_1 = arith.constant 0 : i32
    return %c0_i32, %c0_i32_0 : i32, i32
  }
  func.func @transform_2(%arg0: i32) -> (i32, i32) {
    %c0_i32 = arith.constant 0 : i32
    %c0_i32_0 = arith.constant 0 : i32
    %c0_i32_1 = arith.constant 0 : i32
    return %c0_i32, %c0_i32_0 : i32, i32
  }
  func.func @transform_3(%arg0: i32) -> (i32, i32, i32) {
    %c0_i32 = arith.constant 0 : i32
    %c0_i32_0 = arith.constant 0 : i32
    %c0_i32_1 = arith.constant 0 : i32
    return %arg0, %c0_i32, %c0_i32_0 : i32, i32, i32
  }
}

</mosaic_0001>

<bundles_post_ra>
// kernel: tpu_custom_call.1
= control target key start
LH: loop header
LB: loop body
LE: loop exit
PB: predicated region body
PF: predicated region fallthrough
CT: control target
= control target key end

     0   :  { %8 = vsyncpa [#allocation3], 0  ;;  %s815_s0 = inlined_call_operand.hbm [shape: bf16[2,8,32], index: 0, kind: input, shape index: {}]   ;;  %s816_s1 = inlined_call_operand.hbm [shape: bf16[32,96], index: 1, kind: input, shape index: {}]   ;;  %s817_s2 = inlined_call_operand.vmem [shape: f32[1,96], index: 2, kind: input, shape index: {}]   ;;  %s818_s3 = inlined_call_operand.hbm [shape: bf16[2,8,96], index: 3, kind: output, shape index: {}]  }
   0x1   :  { %10 = vsyncpa [#allocation3 + $0x1], 0 }
   0x2   :  { %11 = vsyncpa [#allocation6], 0 }
   0x3   :  { %12 = vsyncpa [#allocation4], 0 }
   0x4   :  { %14 = vsyncpa [#allocation4 + $0x1], 0  ;;  %s616_s12 = smov 0   ;;  %s618_s13 = smov 0  }
   0x5   :  { %s620_s14 = smov 0   ;;  %s622_s15 = smov 0  }
   0x6 LB: > { %s637_s16 = sadd.s32 4294967295, %s587_s15   ;;  %s367_s17 = sadd.s32 4294967294, %s587_s15   ;;  %s587_s15 = sphi %s622_s15, %s838_s15   ;;  %s583_s14 = sphi %s620_s14, %s837_s14   ;;  %s579_s13 = sphi %s618_s13, %s836_s13   ;;  %s575_s12 = sphi %s616_s12, %s835_s12  }
   0x7   : > { %p40_p0 = scmp.ne.s32.totalorder %s579_s13, %s575_s12  ;;  %p819_p1 = scmp.eq.s32.totalorder %s637_s16, 0 }
   0x8   : > { %p112_p3 = scmp.eq.s32.totalorder %s367_s17, 1  ;;  %p368_p5 = scmp.ge.s32.totalorder %s587_s15, 1 }
   0x9   : > { %p646_p4 = por %p819_p1, %p40_p0  ;;  %p119_p7 = scmp.lt.s32.totalorder %s587_s15, 3 }
   0xa   : > { %p651_p6 = por %p112_p3, %p40_p0  ;;  %s589_s21 = smov [#allocation5]  }
   0xb   : > { %s822_s18 = scalar_select %p646_p4, 1, 0 }
   0xc   : > { %s823_s19 = scalar_select %p651_p6, 1, 0 }
   0xd   : > { %p656_p8 = pnand %p368_p5, %p119_p7  ;;  %s131_s22 = sshll.u32 %s589_s21, 4  ;;  %s660_s22 = int_to_ptr.vmem [resolvable:$true] %s131_s22 }
   0xe   : > { %s672_s24 = sadd.s32 1, %s587_s15   ;;  %s27_s25 = sadd.s32 1, %s583_s14 }
   0xf   : > { %s824_s20 = scalar_select %p656_p8, 1, 0 }
  0x10   : > { %p404_p9 = pneg %p656_p8  ;;  %s24_s26 = ssub.s32 %s587_s15, %s672_s24 }
  0x11   : > { %s459_s29 = scalar_lea.hbm %s816_s1, 256 }
  0x12   : > { %p667_p11 = pnand %p404_p9, %p819_p1  ;;  %p460_p12 = scmp.ne.s32.totalorder %s816_s1, %s459_s29 }
  0x13   : > { %p466_p5 = scmp.lt.u32.totalorder %s459_s29, %s816_s1 }
  0x14   : > { %p461_p13 = pneg %p667_p11 }
  0x16   : > { %p462_p0 = pnand %p461_p13, %p460_p12 }
  0x18   : > { %p463_p3 = pneg %p462_p0 }
  0x1a   : > { %p468_p7 = pnand %p466_p5, %p463_p3 }
  0x1c   : > { %471 = shalt.err (!%p468_p7)
}
  0x1d   : > { %s472_s7 = scalar_lea.vmem %s660_s22, 256  ;;  %p480_p2 = scmp.lt.s32.totalorder %s660_s22, %s660_s22 }
  0x1e   : > { %p473_p9 = scmp.ne.s32.totalorder %s660_s22, %s472_s7  ;;  %p481_p6 = scmp.lt.s32.totalorder %s472_s7, %s472_s7 }
  0x20   : > { %p475_p10 = pnand %p473_p9, %p461_p13  ;;  %p482_p4 = por %p481_p6, %p480_p2 }
  0x22   : > { %p476_p1 = pneg %p475_p10 }
  0x24   : > { %p483_p8 = pnand %p482_p4, %p476_p1 }
  0x26   : > { %486 = shalt.err (!%p483_p8)
}
  0x27   : > { %s590_s8 = smov 64   ;;  %s591_s9 = smov 4  }
  0x28   : > { %407 = dma.hbm_to_vmem [thread:$0]  (!%p667_p11), %s816_s1, 256, %s660_s22, [#allocation6], %s590_s8, %s590_s8, %s591_s9  }
  0x29   : > { %p25_p2 = scmp.eq.s32.totalorder %s24_s26, 0  ;;  %p34_p1 = scmp.ne.s32.totalorder %s583_s14, %s579_s13 }
  0x2a   : > { %p35_p4 = scmp.eq.s32.totalorder %s587_s15, 0  ;;  %p417_p6 = scmp.lt.s32.totalorder %s587_s15, 2 }
  0x2b   : > { %s703_s17 = scalar_select %p25_p2, %s583_s14, %s27_s25  }
  0x2c   : > { %p36_p8 = por %p35_p4, %p34_p1  ;;  %p826_p10 = scmp.eq.s32.totalorder %s637_s16, 1 }
  0x2d   : > { %s148_s27 = sand.u32 1, %s583_s14   ;;  %s372_s28 = sshll.u32 %s587_s15, 6 }
  0x2e   : > { %p707_p12 = por %p826_p10, %p34_p1  ;;  %s371_s29 = sshll.u32 %s148_s27, 2 }
  0x2f   : > { %s716_s4 = scalar_lea.hbm %s815_s0, %s372_s28  ;;  %s152_s22 = scalar_lea.vmem [#allocation2], %s371_s29 }
  0x30   : > { %s159_s25 = sshll.u32 %s152_s22, 4  ;;  %p718_p11 = pnand %p417_p6, %p36_p8  ;;  %s722_s25 = int_to_ptr.vmem [resolvable:$true] %s159_s25 }
  0x31   : > { %s149_s5 = scalar_lea.sflag [#allocation3], %s148_s27  ;;  %s487_s6 = scalar_lea.hbm %s716_s4, 64 }
  0x32   : > { %p488_p13 = scmp.ne.s32.totalorder %s716_s4, %s487_s6  ;;  %p489_p0 = pneg %p718_p11 }
  0x33   : > { %s492_s9 = scalar_lea.hbm %s815_s0, 128  ;;  %p493_p7 = scmp.lt.u32.totalorder %s716_s4, %s815_s0 }
  0x34   : > { %p490_p3 = pnand %p489_p0, %p488_p13  ;;  %p494_p9 = scmp.lt.u32.totalorder %s492_s9, %s487_s6 }
  0x35   : > { %p496_p1 = scmp.lt.u32.totalorder %s487_s6, %s716_s4 }
  0x36   : > { %p491_p5 = pneg %p490_p3  ;;  %p495_p2 = por %p494_p9, %p493_p7 }
  0x38   : > { %p497_p4 = por %p496_p1, %p495_p2 }
  0x3a   : > { %p498_p6 = pnand %p497_p4, %p491_p5 }
  0x3c   : > { %501 = shalt.err (!%p498_p6)
}
  0x3d   : > { %s502_s27 = scalar_lea.vmem %s722_s25, 64  ;;  %s592_s28 = smov [#allocation2]  }
  0x3e   : > { %p503_p8 = scmp.ne.s32.totalorder %s722_s25, %s502_s27  ;;  %s507_s29 = sshll.u32 %s592_s28, 4  ;;  %s508_s29 = int_to_ptr.vmem [resolvable:$false] %s507_s29 }
  0x3f   : > { %s509_s23 = scalar_lea.vmem %s508_s29, 128  ;;  %p510_p3 = scmp.lt.s32.totalorder %s722_s25, %s508_s29 }
  0x40   : > { %p505_p10 = pnand %p503_p8, %p489_p0  ;;  %p511_p7 = scmp.lt.s32.totalorder %s509_s23, %s502_s27 }
  0x42   : > { %p506_p13 = pneg %p505_p10  ;;  %p512_p9 = por %p511_p7, %p510_p3 }
  0x44   : > { %p513_p2 = pnand %p512_p9, %p506_p13 }
  0x46   : > { %516 = shalt.err (!%p513_p2)
}
  0x47   : > { %411 = dma.hbm_to_vmem [thread:$0]  (!%p718_p11), %s716_s4, 64, %s722_s25, %s149_s5  }
  0x48   : > { %p829_p5 = scmp.ne.s32.totalorder %s824_s20, 0 }
  0x49   : > { %s752_s30 = sand.u32 (!%p829_p5), 1, %s579_s13   ;;  %p830_p0 = scmp.ne.s32.totalorder (!%p829_p5), %s822_s18, 0 }
  0x4a   : > { %168 = sbr.rel (%p829_p5) target bundleno = 324 (0x144), region = 32  ;;  %s374_s22 = sshll.u32 (!%p829_p5), %s752_s30, 2 }
  0x4b   : > { %s171_s6 = scalar_lea.sflag (!%p829_p5), [#allocation3], %s752_s30  ;;  %s174_s7 = scalar_lea.vmem (!%p829_p5), [#allocation2], %s374_s22 }
  0x51   : > { %562 = dma.done.wait (%p830_p0), %s171_s6, 64  }
  0x52   : > { %564 = vsyncadd (%p830_p0), %s171_s6, 4294967232  ;;  %p831_p1 = scmp.eq.s32.totalorder %s637_s16, 0 }
  0x54   : > { %566 = dma.done.wait (%p831_p1), [#allocation6], 256   ;;  %p832_p11 = pmov %p831_p1 }
  0x55   : > { %v593_v0 = vmov 0.0   ;;  %vm594_vm0 = vmmov 0   ;;  %v457_v1 = vld [vmem:[#allocation5] sm:$0xff]   ;;  %v458_v2 = vld [vmem:[#allocation5 + $0x8] sm:$0xff]   ;;  %v202_v3 = vld [vmem:[%s174_s7] sm:$0xf] }
  0x56   : > { %568 = vsyncadd (%p832_p11), [#allocation6], 4294967040  ;;  %388 = vmatprep.subr.bf16.mxu0 %v593_v0  ;;  %392 = vmatprep.mubr.msk.bf16.mxu0 %vm594_vm0, %v593_v0  ;;  %vm226_vm1 = vcmask 261120   ;;  %v377_v4 = vld [vmem:[%s817_s2] ss:$0 sm:$0xff]  ;;  %s382_s4 = sshll.u32 %s637_s16, 6 }
  0x57   : > { %389 = vmatpush3.bf16.msra.mxu0 %v457_v1  ;;  %s200_s25 = scalar_lea.vmem [#allocation7], %s374_s22  ;;  %vm271_vm2 = vcmask 781312   ;;  %s771_s9 = scalar_lea.hbm %s818_s3, %s382_s4 }
  0x58   : > { %390 = vmatprep.subr.bf16.mxu0 %v593_v0  ;;  %s287_s26 = sshll.u32 %s200_s25, 4  ;;  %s274_s16 = scalar_lea.sflag [#allocation4], %s752_s30  ;;  %s773_s26 = int_to_ptr.vmem [resolvable:$true] %s287_s26 }
  0x59   : > { %s517_s10 = scalar_lea.vmem %s773_s26, 64  ;;  %s595_s11 = smov [#allocation7]  }
  0x5a   : > { %p518_p4 = scmp.ne.s32.totalorder %s773_s26, %s517_s10  ;;  %s521_s27 = sshll.u32 %s595_s11, 4  ;;  %s522_s27 = int_to_ptr.vmem [resolvable:$false] %s521_s27 }
  0x5b   : > { %391 = vmatpush3.bf16.msra.mxu0 %v458_v2  ;;  %s523_s28 = scalar_lea.vmem %s522_s27, 128  ;;  %p524_p10 = scmp.lt.s32.totalorder %s773_s26, %s522_s27 }
  0x5c   : > { %p519_p6 = pnand %p518_p4, %p707_p12  ;;  %p525_p13 = scmp.lt.s32.totalorder %s523_s28, %s517_s10 }
  0x5e   : > { %393 = vmatmul.mubr.msk.bf16.vlgmr.msra.gmra.mrb[0].mxu0 %vm226_vm1, %v202_v3  ;;  %p520_p8 = pneg %p519_p6  ;;  %p526_p3 = por %p525_p13, %p524_p10 }
  0x60   : > { %p527_p7 = pnand %p526_p3, %p520_p8 }
 0x131   : > { %v264_v5 = vpop.f32.mrb[0].mxu0 }
 0x132   : > { %v265_v6 = vadd.f32 %v377_v4, %v264_v5  ;;  %v394_v7 = vpop.f32.mrb[1].mxu0 }
 0x133   : > { %v267_v8 = vpop.f32.mrb[2].mxu0 }
 0x134   : > { %v270_v9 = vpack.c.bf16 %v265_v6, %v265_v6  ;;  %v395_v10 = vpop.f32.mrb[3].mxu0 }
 0x136   : > { %272 = vst.msk [vmem:[%s200_s25] sm:$0xf] %vm271_vm2, %v270_v9 }
 0x137   : > { %530 = shalt.err (!%p527_p7)
}
 0x138   : > { %s531_s29 = scalar_lea.hbm %s771_s9, 64  ;;  %s535_s22 = scalar_lea.hbm %s818_s3, 128 }
 0x139   : > { %p532_p9 = scmp.ne.s32.totalorder %s771_s9, %s531_s29  ;;  %p536_p0 = scmp.lt.u32.totalorder %s771_s9, %s818_s3 }
 0x13a   : > { %p537_p1 = scmp.lt.u32.totalorder %s535_s22, %s531_s29  ;;  %p539_p4 = scmp.lt.u32.totalorder %s531_s29, %s771_s9 }
 0x13b   : > { %p533_p2 = pnand %p532_p9, %p707_p12 }
 0x13c   : > { %p538_p11 = por %p537_p1, %p536_p0 }
 0x13d   : > { %p534_p5 = pneg %p533_p2 }
 0x13e   : > { %p540_p6 = por %p539_p4, %p538_p11 }
 0x140   : > { %p541_p8 = pnand %p540_p6, %p534_p5 }
 0x142   : > { %544 = shalt.err (!%p541_p8)
}
 0x143   : > { %402 = dma.vmem_to_hbm [thread:$0]  (%p707_p12), %s773_s26, 64, %s771_s9, %s274_s16  }
 0x144 PF: > { %s299_s18 = sand.u32 1, %s575_s12   ;;  %p833_p10 = scmp.ne.s32.totalorder %s823_s19, 0 }
 0x145   : > { %p834_p13 = scmp.ge.s32.totalorder %s587_s15, 2  ;;  %s300_s20 = scalar_lea.sflag [#allocation4], %s299_s18 }
 0x147   : > { %p413_p3 = pnand %p834_p13, %p833_p10 }
 0x149   : > { %570 = dma.done.wait (!%p413_p3), %s300_s20, 64  }
 0x14a   : > { %572 = vsyncadd (!%p413_p3), %s300_s20, 4294967232  ;;  %p17_p7 = scmp.ge.s32.totalorder %s672_s24, 4   ;;  %s835_s12 = smov %s579_s13 }
 0x14b   : > { %s836_s13 = smov %s583_s14  ;;  %s837_s14 = smov %s703_s17 }
 0x14c   : > { %s838_s15 = smov %s672_s24  ;;  %19 = sbr.rel (!%p17_p7) target bundleno = 6 (0x6), region = 81 }
 0x153   :  { %305 = vsyncpa [#allocation3], 1 }
 0x154   :  { %307 = vsyncpa [#allocation3 + $0x1], 1 }
 0x155   :  { %308 = vsyncpa [#allocation6], 1 }
 0x156   :  { %309 = vsyncpa [#allocation4], 1 }
 0x157   :  { %311 = vsyncpa [#allocation4 + $0x1], 1 }

</bundles_post_ra>
